<compile_context>
chip_gen: v7x
topology: tpu7x:2x2x1
jax: 0.10.0
libtpu: 0.0.40
codegen_flags: <defaults>
</compile_context>

<pallas_src>
import functools

import jax
import jax.numpy as jnp
from jax import lax
from jax.experimental import pallas as pl
from jax.experimental.pallas import tpu as pltpu

LANES = 128      # points per lane row
TR_MAX = 512     # max rows of 128 points per grid step -> up to 65536 pts/step
CHUNK = 32       # rows per in-kernel chunk (matches int8 native sublane tile)
ROW_ALIGN = 32   # row alignment (int8 tiling + chunk divisibility)
_PAD_LABEL = -2  # never a valid class and contributes 0 everywhere


def _round_up(x, m):
    return (x + m - 1) // m * m


def _cdiv(a, b):
    return -(-a // b)


def _ce_stats_kernel(pred_ref, tgt_ref, z_ref, loss_ref, stats_ref, *,
                     num_classes, ignore_index, loss_weight, chunk):
    """Per-point cross entropy + merged per-tile partial stats (lane-dense).

    pred_ref: (C, TR, 128) float   tgt_ref: (TR, 128) int8   z_ref: (TR, 128) f32
    loss_ref: (TR, 128) f32        stats_ref: (1, C+2, 128) f32
    """
    tr = z_ref.shape[0]
    nchunks = tr // chunk

    def body(ci, carry):
        zg, zp = carry[0], carry[1]
        cnts = carry[2:]
        r0 = pl.multiple_of(ci * chunk, chunk)

        tgt = tgt_ref[pl.ds(r0, chunk), :].astype(jnp.int32)
        z = z_ref[pl.ds(r0, chunk), :]

        # Pass A over the tiny class axis: running max (numerically stable LSE).
        m = pred_ref[0, pl.ds(r0, chunk), :].astype(jnp.float32)
        for cc in range(1, num_classes):
            m = jnp.maximum(
                m, pred_ref[cc, pl.ds(r0, chunk), :].astype(jnp.float32))

        # Pass B: sum-exp, target logit, per-class counts.  Logits are re-read
        # from VMEM (cheap ld slots) so the live vreg set stays small.
        s = jnp.zeros_like(m)
        tgt_logit = jnp.zeros_like(m)
        new_cnts = []
        for cc in range(num_classes):
            xc = pred_ref[cc, pl.ds(r0, chunk), :].astype(jnp.float32)
            s = s + jnp.exp(xc - m)
            hit = tgt == cc
            tgt_logit = jnp.where(hit, xc, tgt_logit)
            new_cnts.append(
                cnts[cc] + jnp.sum(hit.astype(jnp.float32), axis=0,
                                   keepdims=True))

        ce = jnp.where(tgt != ignore_index, (m + jnp.log(s)) - tgt_logit, 0.0)
        if loss_weight != 1.0:
            ce = ce * jnp.float32(loss_weight)
        loss_ref[pl.ds(r0, chunk), :] = ce

        zg = jnp.maximum(zg, jnp.max(jnp.where(tgt == 0, z, -jnp.inf),
                                     axis=0, keepdims=True))
        zp = jnp.minimum(zp, jnp.min(jnp.where(tgt == 1, z, jnp.inf),
                                     axis=0, keepdims=True))
        return (zg, zp) + tuple(new_cnts)

    init = (jnp.full((1, LANES), -jnp.inf, jnp.float32),
            jnp.full((1, LANES), jnp.inf, jnp.float32)) + tuple(
                jnp.zeros((1, LANES), jnp.float32) for _ in range(num_classes))
    final = lax.fori_loop(0, nchunks, body, init)

    stats = jnp.concatenate(list(final), axis=0)          # (C+2, 128)
    stats_ref[...] = stats.reshape(1, num_classes + 2, LANES)


def _weighted_sum_kernel(loss_ref, z_ref, tgt_ref, params_ref, out_ref, *,
                         num_classes, inv_two_sigma2, chunk):
    """gauss(z; mu, sigma) * class_weight[tgt] * ce_loss, per-tile partial sum.

    params_ref (SMEM): [mu, w_0 .. w_{C-1}]
    """
    tr = z_ref.shape[0]
    nchunks = tr // chunk

    mu = params_ref[0]
    cws = [params_ref[1 + cc] for cc in range(num_classes)]
    scale = jnp.float32(inv_two_sigma2)

    def body(ci, acc):
        r0 = pl.multiple_of(ci * chunk, chunk)
        z = z_ref[pl.ds(r0, chunk), :]
        tgt = tgt_ref[pl.ds(r0, chunk), :].astype(jnp.int32)
        l = loss_ref[pl.ds(r0, chunk), :]

        d = z - mu
        gauss = jnp.exp(-(d * d) * scale)
        cw = jnp.zeros_like(z)
        for cc in range(num_classes):
            cw = jnp.where(tgt == cc, cws[cc], cw)
        return acc + l * gauss * cw

    acc = lax.fori_loop(0, nchunks, body,
                        jnp.zeros((chunk, LANES), jnp.float32))
    out_ref[...] = jnp.sum(acc, axis=0, keepdims=True).reshape(1, 1, LANES)


def gauss_class_cross_entropy_loss(pred, segment, coord, *,
                                   sigma=0.1, loss_weight=1.0, ignore_index=-1):
    n, c = pred.shape
    assert c >= 2, "needs at least ground(0) and plant(1) classes"

    # ---- tile policy --------------------------------------------------------
    # rows of 128 points, 32-aligned (int8 tiling / chunk loop); tiles chosen
    # to (a) be big enough to amortize per-step overhead, (b) keep >=2 grid
    # steps when possible so the "parallel" axis shards across v7x's 2 TCs,
    # (c) minimize pad rows.
    rows_min = _round_up(max(_cdiv(n, LANES), 1), ROW_ALIGN)
    g = max(2 if rows_min > ROW_ALIGN else 1, _cdiv(rows_min, TR_MAX))
    tr = _round_up(_cdiv(rows_min, g), ROW_ALIGN)
    rows = g * tr
    n_pad = rows * LANES

    # ---- wrapper layout plumbing -------------------------------------------
    pred_in = pred if jnp.issubdtype(pred.dtype, jnp.floating) \
        else pred.astype(jnp.float32)
    tgt = segment.astype(jnp.int8)            # values in {-2..C-1}
    z = coord[:, 2].astype(jnp.float32)
    if n_pad != n:
        pad = n_pad - n
        pred_in = jnp.pad(pred_in, ((0, pad), (0, 0)))
        tgt = jnp.pad(tgt, (0, pad), constant_values=_PAD_LABEL)
        z = jnp.pad(z, (0, pad))

    # Lane-dense layouts: points on the 128-wide lane axis everywhere.
    # One-time transpose of pred; a producer emitting (C, N) logits would
    # remove this copy entirely.
    pred_t = pred_in.T.reshape(c, rows, LANES)   # (C, R, 128)
    tgt2 = tgt.reshape(rows, LANES)
    z2 = z.reshape(rows, LANES)

    # ---- pass 1: cross entropy + merged per-tile stats ----------------------
    k1 = functools.partial(_ce_stats_kernel, num_classes=c,
                           ignore_index=int(ignore_index),
                           loss_weight=float(loss_weight), chunk=CHUNK)
    loss, stats = pl.pallas_call(
        k1,
        out_shape=(
            jax.ShapeDtypeStruct((rows, LANES), jnp.float32),    # per-point CE
            jax.ShapeDtypeStruct((g, c + 2, LANES), jnp.float32),  # zg|zp|counts
        ),
        grid=(g,),
        in_specs=[
            pl.BlockSpec((c, tr, LANES), lambda i: (0, i, 0)),
            pl.BlockSpec((tr, LANES), lambda i: (i, 0)),
            pl.BlockSpec((tr, LANES), lambda i: (i, 0)),
        ],
        out_specs=(
            pl.BlockSpec((tr, LANES), lambda i: (i, 0)),
            pl.BlockSpec((1, c + 2, LANES), lambda i: (i, 0, 0)),
        ),
        compiler_params=pltpu.CompilerParams(
            dimension_semantics=("parallel",)),
    )(pred_t, tgt2, z2)

    # ---- scalar glue: mu and dynamic class weights --------------------------
    zg_part = stats[:, 0, :]
    zp_part = stats[:, 1, :]
    cnt_part = stats[:, 2:, :]
    counts_i = jnp.sum(cnt_part.astype(jnp.int32), axis=(0, 2))   # exact counts
    z_ground_max = jnp.where(counts_i[0] > 0, jnp.max(zg_part), 0.0)
    z_plant_min = jnp.where(counts_i[1] > 0, jnp.min(zp_part), 0.0)
    mu = z_ground_max + (z_plant_min - z_ground_max) * 0.5
    class_w = jnp.where(counts_i > 0,
                        jnp.float32(n) / counts_i.astype(jnp.float32), 0.0)
    params = jnp.concatenate([mu.reshape(1), class_w]).astype(jnp.float32)

    # ---- pass 2: gaussian * class weight * loss, per-tile partial sums ------
    k2 = functools.partial(_weighted_sum_kernel, num_classes=c,
                           inv_two_sigma2=1.0 / (2.0 * float(sigma) ** 2),
                           chunk=CHUNK)
    part = pl.pallas_call(
        k2,
        out_shape=jax.ShapeDtypeStruct((g, 1, LANES), jnp.float32),
        grid=(g,),
        in_specs=[
            pl.BlockSpec((tr, LANES), lambda i: (i, 0)),
            pl.BlockSpec((tr, LANES), lambda i: (i, 0)),
            pl.BlockSpec((tr, LANES), lambda i: (i, 0)),
            pl.BlockSpec(memory_space=pltpu.MemorySpace.SMEM),  # [mu, w_0..w_{C-1}]
        ],
        out_specs=pl.BlockSpec((1, 1, LANES), lambda i: (i, 0, 0)),
        compiler_params=pltpu.CompilerParams(
            dimension_semantics=("parallel",)),
    )(loss, z2, tgt2, params)

    # mean over ALL N points (matches the module's `.mean()` on the length-N
    # weighted loss; ignored/padded points contribute exactly 0).
    return jnp.sum(part) / jnp.float32(n)


def _reference(pred, segment, coord, *, sigma=0.1, loss_weight=1.0, ignore_index=-1):
    n, c = pred.shape
    logp = jax.nn.log_softmax(pred.astype(jnp.float32), axis=-1)
    valid = segment != ignore_index
    tgt_safe = jnp.where(valid, segment, 0)
    ce = -jnp.take_along_axis(logp, tgt_safe[:, None], axis=-1)[:, 0]
    ce = jnp.where(valid, ce, 0.0) * loss_weight
    z = coord[:, 2].astype(jnp.float32)
    ground = segment == 0
    plant = segment == 1
    zg = jnp.where(ground.any(), jnp.max(jnp.where(ground, z, -jnp.inf)), 0.0)
    zp = jnp.where(plant.any(), jnp.min(jnp.where(plant, z, jnp.inf)), 0.0)
    mu = zg + (zp - zg) / 2.0
    gauss = jnp.exp(-((z - mu) ** 2) / (2.0 * sigma * sigma))
    counts = jnp.sum(jax.nn.one_hot(segment, c, dtype=jnp.float32), axis=0)
    cw_cls = jnp.where(counts > 0, n / counts, 0.0)
    cw = cw_cls[tgt_safe]
    cw = jnp.where(valid, cw, 0.0)  # ignored points contribute 0 either way
    return jnp.mean(ce * gauss * cw)


if __name__ == "__main__":
    key = jax.random.PRNGKey(0)
    N, C = 256, 4
    k1, k2, k3 = jax.random.split(key, 3)
    pred = jax.random.normal(k1, (N, C), dtype=jnp.float32)
    segment = jax.random.randint(k2, (N,), 0, C, dtype=jnp.int32)
    # guarantee both ground (0) and plant (1) points exist, plus some ignored
    segment = segment.at[0].set(0).at[1].set(1).at[2].set(-1).at[3].set(-1)
    coord = jax.random.uniform(k3, (N, 3), dtype=jnp.float32)

    out = gauss_class_cross_entropy_loss(pred, segment, coord,
                                         sigma=0.1, loss_weight=1.0,
                                         ignore_index=-1)
    out = jax.block_until_ready(out)

    ref = _reference(pred, segment, coord, sigma=0.1, loss_weight=1.0,
                     ignore_index=-1)
    assert jnp.allclose(out, ref, rtol=1e-3, atol=1e-5), (out, ref)

    print("KERNEL_OK")
</pallas_src>

<mosaic_0001>
module attributes {stable_mosaic.version = 11 : i64} {
  func.func @_ce_stats_kernel(%arg0: i32, %arg1: memref<4x32x128xf32, #tpu.memory_space<vmem>>, %arg2: memref<32x128xi8, #tpu.memory_space<vmem>>, %arg3: memref<32x128xf32, #tpu.memory_space<vmem>>, %arg4: memref<32x128xf32, #tpu.memory_space<vmem>>, %arg5: memref<1x6x128xf32, #tpu.memory_space<vmem>>) attributes {dimension_semantics = [#tpu.dimension_semantics<parallel>], iteration_bounds = array<i64: 1>, scalar_prefetch = 0 : i64, scratch_operands = 0 : i64, tpu.core_type = #tpu.core_type<tc>, window_params = [{transform_indices = @transform_0, window_bounds = array<i64: 4, 32, 128>}, {transform_indices = @transform_1, window_bounds = array<i64: 32, 128>}, {transform_indices = @transform_2, window_bounds = array<i64: 32, 128>}, {transform_indices = @transform_3, window_bounds = array<i64: 32, 128>}, {transform_indices = @transform_4, window_bounds = array<i64: 1, 6, 128>}]} {
    %cst = arith.constant 0xFF800000 : f32
    %0 = vector.broadcast %cst : f32 to vector<1x128xf32>
    %cst_0 = arith.constant 0x7F800000 : f32
    %1 = vector.broadcast %cst_0 : f32 to vector<1x128xf32>
    %cst_1 = arith.constant 0.000000e+00 : f32
    %2 = vector.broadcast %cst_1 : f32 to vector<1x128xf32>
    %cst_2 = arith.constant 0.000000e+00 : f32
    %3 = vector.broadcast %cst_2 : f32 to vector<1x128xf32>
    %cst_3 = arith.constant 0.000000e+00 : f32
    %4 = vector.broadcast %cst_3 : f32 to vector<1x128xf32>
    %cst_4 = arith.constant 0.000000e+00 : f32
    %5 = vector.broadcast %cst_4 : f32 to vector<1x128xf32>
    %c0_i32 = arith.constant 0 : i32
    %c32_i32 = arith.constant 32 : i32
    %6 = arith.muli %c0_i32, %c32_i32 : i32
    %7 = tpu.assume_multiple %6, 32 : i32
    %8 = arith.index_cast %7 : i32 to index
    %c0 = arith.constant 0 : index
    %9 = vector.load %arg2[%8, %c0] : memref<32x128xi8, #tpu.memory_space<vmem>>, vector<32x128xi8>
    %10 = arith.extsi %9 : vector<32x128xi8> to vector<32x128xi32>
    %11 = arith.index_cast %7 : i32 to index
    %c0_5 = arith.constant 0 : index
    %12 = vector.load %arg3[%11, %c0_5] : memref<32x128xf32, #tpu.memory_space<vmem>>, vector<32x128xf32>
    %c0_6 = arith.constant 0 : index
    %13 = arith.index_cast %7 : i32 to index
    %c0_7 = arith.constant 0 : index
    %14 = vector.load %arg1[%c0_6, %13, %c0_7] : memref<4x32x128xf32, #tpu.memory_space<vmem>>, vector<1x32x128xf32>
    %15 = vector.shape_cast %14 : vector<1x32x128xf32> to vector<32x128xf32>
    %c1 = arith.constant 1 : index
    %16 = arith.index_cast %7 : i32 to index
    %c0_8 = arith.constant 0 : index
    %17 = vector.load %arg1[%c1, %16, %c0_8] : memref<4x32x128xf32, #tpu.memory_space<vmem>>, vector<1x32x128xf32>
    %18 = vector.shape_cast %17 : vector<1x32x128xf32> to vector<32x128xf32>
    %19 = arith.maximumf %15, %18 : vector<32x128xf32>
    %c2 = arith.constant 2 : index
    %20 = arith.index_cast %7 : i32 to index
    %c0_9 = arith.constant 0 : index
    %21 = vector.load %arg1[%c2, %20, %c0_9] : memref<4x32x128xf32, #tpu.memory_space<vmem>>, vector<1x32x128xf32>
    %22 = vector.shape_cast %21 : vector<1x32x128xf32> to vector<32x128xf32>
    %23 = arith.maximumf %19, %22 : vector<32x128xf32>
    %c3 = arith.constant 3 : index
    %24 = arith.index_cast %7 : i32 to index
    %c0_10 = arith.constant 0 : index
    %25 = vector.load %arg1[%c3, %24, %c0_10] : memref<4x32x128xf32, #tpu.memory_space<vmem>>, vector<1x32x128xf32>
    %26 = vector.shape_cast %25 : vector<1x32x128xf32> to vector<32x128xf32>
    %27 = arith.maximumf %23, %26 : vector<32x128xf32>
    %cst_11 = arith.constant 0.000000e+00 : f32
    %28 = vector.broadcast %cst_11 : f32 to vector<32x128xf32>
    %cst_12 = arith.constant 0.000000e+00 : f32
    %29 = vector.broadcast %cst_12 : f32 to vector<32x128xf32>
    %c0_13 = arith.constant 0 : index
    %30 = arith.index_cast %7 : i32 to index
    %c0_14 = arith.constant 0 : index
    %31 = vector.load %arg1[%c0_13, %30, %c0_14] : memref<4x32x128xf32, #tpu.memory_space<vmem>>, vector<1x32x128xf32>
    %32 = vector.shape_cast %31 : vector<1x32x128xf32> to vector<32x128xf32>
    %33 = arith.subf %32, %27 : vector<32x128xf32>
    %34 = math.exp %33 : vector<32x128xf32>
    %35 = arith.addf %28, %34 : vector<32x128xf32>
    %c0_i32_15 = arith.constant 0 : i32
    %36 = vector.broadcast %c0_i32_15 : i32 to vector<32x128xi32>
    %37 = arith.cmpi eq, %10, %36 : vector<32x128xi32>
    %38 = arith.select %37, %32, %29 : vector<32x128xi1>, vector<32x128xf32>
    %39 = arith.extui %37 : vector<32x128xi1> to vector<32x128xi32>
    %40 = arith.sitofp %39 : vector<32x128xi32> to vector<32x128xf32>
    %cst_16 = arith.constant dense<0.000000e+00> : vector<128xf32>
    %41 = vector.multi_reduction <add>, %40, %cst_16 [0] : vector<32x128xf32> to vector<128xf32>
    %42 = vector.shape_cast %41 : vector<128xf32> to vector<1x128xf32>
    %43 = arith.addf %2, %42 : vector<1x128xf32>
    %c1_17 = arith.constant 1 : index
    %44 = arith.index_cast %7 : i32 to index
    %c0_18 = arith.constant 0 : index
    %45 = vector.load %arg1[%c1_17, %44, %c0_18] : memref<4x32x128xf32, #tpu.memory_space<vmem>>, vector<1x32x128xf32>
    %46 = vector.shape_cast %45 : vector<1x32x128xf32> to vector<32x128xf32>
    %47 = arith.subf %46, %27 : vector<32x128xf32>
    %48 = math.exp %47 : vector<32x128xf32>
    %49 = arith.addf %35, %48 : vector<32x128xf32>
    %c1_i32 = arith.constant 1 : i32
    %50 = vector.broadcast %c1_i32 : i32 to vector<32x128xi32>
    %51 = arith.cmpi eq, %10, %50 : vector<32x128xi32>
    %52 = arith.select %51, %46, %38 : vector<32x128xi1>, vector<32x128xf32>
    %53 = arith.extui %51 : vector<32x128xi1> to vector<32x128xi32>
    %54 = arith.sitofp %53 : vector<32x128xi32> to vector<32x128xf32>
    %cst_19 = arith.constant dense<0.000000e+00> : vector<128xf32>
    %55 = vector.multi_reduction <add>, %54, %cst_19 [0] : vector<32x128xf32> to vector<128xf32>
    %56 = vector.shape_cast %55 : vector<128xf32> to vector<1x128xf32>
    %57 = arith.addf %3, %56 : vector<1x128xf32>
    %c2_20 = arith.constant 2 : index
    %58 = arith.index_cast %7 : i32 to index
    %c0_21 = arith.constant 0 : index
    %59 = vector.load %arg1[%c2_20, %58, %c0_21] : memref<4x32x128xf32, #tpu.memory_space<vmem>>, vector<1x32x128xf32>
    %60 = vector.shape_cast %59 : vector<1x32x128xf32> to vector<32x128xf32>
    %61 = arith.subf %60, %27 : vector<32x128xf32>
    %62 = math.exp %61 : vector<32x128xf32>
    %63 = arith.addf %49, %62 : vector<32x128xf32>
    %c2_i32 = arith.constant 2 : i32
    %64 = vector.broadcast %c2_i32 : i32 to vector<32x128xi32>
    %65 = arith.cmpi eq, %10, %64 : vector<32x128xi32>
    %66 = arith.select %65, %60, %52 : vector<32x128xi1>, vector<32x128xf32>
    %67 = arith.extui %65 : vector<32x128xi1> to vector<32x128xi32>
    %68 = arith.sitofp %67 : vector<32x128xi32> to vector<32x128xf32>
    %cst_22 = arith.constant dense<0.000000e+00> : vector<128xf32>
    %69 = vector.multi_reduction <add>, %68, %cst_22 [0] : vector<32x128xf32> to vector<128xf32>
    %70 = vector.shape_cast %69 : vector<128xf32> to vector<1x128xf32>
    %71 = arith.addf %4, %70 : vector<1x128xf32>
    %c3_23 = arith.constant 3 : index
    %72 = arith.index_cast %7 : i32 to index
    %c0_24 = arith.constant 0 : index
    %73 = vector.load %arg1[%c3_23, %72, %c0_24] : memref<4x32x128xf32, #tpu.memory_space<vmem>>, vector<1x32x128xf32>
    %74 = vector.shape_cast %73 : vector<1x32x128xf32> to vector<32x128xf32>
    %75 = arith.subf %74, %27 : vector<32x128xf32>
    %76 = math.exp %75 : vector<32x128xf32>
    %77 = arith.addf %63, %76 : vector<32x128xf32>
    %c3_i32 = arith.constant 3 : i32
    %78 = vector.broadcast %c3_i32 : i32 to vector<32x128xi32>
    %79 = arith.cmpi eq, %10, %78 : vector<32x128xi32>
    %80 = arith.select %79, %74, %66 : vector<32x128xi1>, vector<32x128xf32>
    %81 = arith.extui %79 : vector<32x128xi1> to vector<32x128xi32>
    %82 = arith.sitofp %81 : vector<32x128xi32> to vector<32x128xf32>
    %cst_25 = arith.constant dense<0.000000e+00> : vector<128xf32>
    %83 = vector.multi_reduction <add>, %82, %cst_25 [0] : vector<32x128xf32> to vector<128xf32>
    %84 = vector.shape_cast %83 : vector<128xf32> to vector<1x128xf32>
    %85 = arith.addf %5, %84 : vector<1x128xf32>
    %c-1_i32 = arith.constant -1 : i32
    %86 = vector.broadcast %c-1_i32 : i32 to vector<32x128xi32>
    %87 = arith.cmpi ne, %10, %86 : vector<32x128xi32>
    %88 = math.log %77 : vector<32x128xf32>
    %89 = arith.addf %27, %88 : vector<32x128xf32>
    %90 = arith.subf %89, %80 : vector<32x128xf32>
    %cst_26 = arith.constant 0.000000e+00 : f32
    %91 = vector.broadcast %cst_26 : f32 to vector<32x128xf32>
    %92 = arith.select %87, %90, %91 : vector<32x128xi1>, vector<32x128xf32>
    %93 = arith.index_cast %7 : i32 to index
    %c0_27 = arith.constant 0 : index
    %94 = vector.load %arg4[%93, %c0_27] : memref<32x128xf32, #tpu.memory_space<vmem>>, vector<32x128xf32>
    tpu.vector_store %arg4[%93, %c0_27], %92 {strides = array<i32>} : memref<32x128xf32, #tpu.memory_space<vmem>>, vector<32x128xf32>,
    %c0_i32_28 = arith.constant 0 : i32
    %95 = vector.broadcast %c0_i32_28 : i32 to vector<32x128xi32>
    %96 = arith.cmpi eq, %10, %95 : vector<32x128xi32>
    %cst_29 = arith.constant 0xFF800000 : f32
    %97 = vector.broadcast %cst_29 : f32 to vector<32x128xf32>
    %98 = arith.select %96, %12, %97 : vector<32x128xi1>, vector<32x128xf32>
    %cst_30 = arith.constant dense<0xFF800000> : vector<128xf32>
    %99 = vector.multi_reduction <maximumf>, %98, %cst_30 [0] : vector<32x128xf32> to vector<128xf32>
    %100 = vector.shape_cast %99 : vector<128xf32> to vector<1x128xf32>
    %101 = arith.maximumf %0, %100 : vector<1x128xf32>
    %c1_i32_31 = arith.constant 1 : i32
    %102 = vector.broadcast %c1_i32_31 : i32 to vector<32x128xi32>
    %103 = arith.cmpi eq, %10, %102 : vector<32x128xi32>
    %cst_32 = arith.constant 0x7F800000 : f32
    %104 = vector.broadcast %cst_32 : f32 to vector<32x128xf32>
    %105 = arith.select %103, %12, %104 : vector<32x128xi1>, vector<32x128xf32>
    %cst_33 = arith.constant dense<0x7F800000> : vector<128xf32>
    %106 = vector.multi_reduction <minimumf>, %105, %cst_33 [0] : vector<32x128xf32> to vector<128xf32>
    %107 = vector.shape_cast %106 : vector<128xf32> to vector<1x128xf32>
    %108 = arith.minimumf %1, %107 : vector<1x128xf32>
    %c1_i32_34 = arith.constant 1 : i32
    %109 = tpu.concatenate %101, %108, %43, %57, %71, %85 in 0 : vector<1x128xf32>, vector<1x128xf32>, vector<1x128xf32>, vector<1x128xf32>, vector<1x128xf32>, vector<1x128xf32> -> vector<6x128xf32>
    %110 = vector.shape_cast %109 : vector<6x128xf32> to vector<1x6x128xf32>
    %c0_35 = arith.constant 0 : index
    %c0_36 = arith.constant 0 : index
    %c0_37 = arith.constant 0 : index
    %111 = vector.load %arg5[%c0_35, %c0_36, %c0_37] : memref<1x6x128xf32, #tpu.memory_space<vmem>>, vector<1x6x128xf32>
    tpu.vector_store %arg5[%c0_35, %c0_36, %c0_37], %110 {strides = array<i32>} : memref<1x6x128xf32, #tpu.memory_space<vmem>>, vector<1x6x128xf32>,
    return
  }
  func.func @transform_0(%arg0: i32) -> (i32, i32, i32) {
    %c0_i32 = arith.constant 0 : i32
    %c0_i32_0 = arith.constant 0 : i32
    %c0_i32_1 = arith.constant 0 : i32
    return %c0_i32, %arg0, %c0_i32_0 : i32, i32, i32
  }
  func.func @transform_1(%arg0: i32) -> (i32, i32) {
    %c0_i32 = arith.constant 0 : i32
    %c0_i32_0 = arith.constant 0 : i32
    return %arg0, %c0_i32 : i32, i32
  }
  func.func @transform_2(%arg0: i32) -> (i32, i32) {
    %c0_i32 = arith.constant 0 : i32
    %c0_i32_0 = arith.constant 0 : i32
    return %arg0, %c0_i32 : i32, i32
  }
  func.func @transform_3(%arg0: i32) -> (i32, i32) {
    %c0_i32 = arith.constant 0 : i32
    %c0_i32_0 = arith.constant 0 : i32
    return %arg0, %c0_i32 : i32, i32
  }
  func.func @transform_4(%arg0: i32) -> (i32, i32, i32) {
    %c0_i32 = arith.constant 0 : i32
    %c0_i32_0 = arith.constant 0 : i32
    %c0_i32_1 = arith.constant 0 : i32
    return %arg0, %c0_i32, %c0_i32_0 : i32, i32, i32
  }
}

</mosaic_0001>

<bundles_post_ra>
// kernel: tpu_custom_call.1
= control target key start
LH: loop header
LB: loop body
LE: loop exit
PB: predicated region body
PF: predicated region fallthrough
CT: control target
= control target key end

     0   :  { %10 = vsyncpa [#allocation3], 0  ;;  %s848_s0 = inlined_call_operand.hbm [shape: f32[4,32,128], index: 0, kind: input, shape index: {}]   ;;  %s849_s1 = inlined_call_operand.hbm [shape: s8[32,128], index: 1, kind: input, shape index: {}]   ;;  %s850_s2 = inlined_call_operand.hbm [shape: f32[32,128], index: 2, kind: input, shape index: {}]   ;;  %s851_s3 = inlined_call_operand.hbm [shape: f32[32,128], index: 3, kind: output, shape index: {0}]   ;;  %s852_s4 = inlined_call_operand.vmem [shape: f32[1,6,128], index: 4, kind: output, shape index: {1}]  }
   0x1   :  { %11 = vsyncpa [#allocation6], 0 }
   0x2   :  { %12 = vsyncpa [#allocation4], 0  ;;  %s514_s15 = smov [#allocation5]   ;;  %s515_s17 = smov [#allocation2]  }
   0x3   :  { %s31_s16 = sshll.u32 %s514_s15, 4  ;;  %s18_s18 = sshll.u32 %s515_s17, 4  ;;  %s32_s16 = int_to_ptr.vmem [resolvable:$true] %s31_s16  ;;  %s546_s18 = int_to_ptr.vmem [resolvable:$true] %s18_s18 }
   0x4   :  { %s420_s21 = scalar_lea.hbm %s849_s1, 128 }
   0x5   :  { %p421_p0 = scmp.ne.s32.totalorder %s849_s1, %s420_s21  ;;  %p424_p1 = scmp.lt.u32.totalorder %s420_s21, %s849_s1 }
   0x7   :  { %p426_p2 = pnand %p424_p1, %p421_p0 }
   0x9   :  { %429 = shalt.err (!%p426_p2)
}
   0xa   :  { %s430_s26 = scalar_lea.vmem %s32_s16, 128  ;;  %p435_p4 = scmp.lt.s32.totalorder %s32_s16, %s32_s16 }
   0xb   :  { %p431_p3 = scmp.ne.s32.totalorder %s32_s16, %s430_s26  ;;  %p436_p5 = scmp.lt.s32.totalorder %s430_s26, %s430_s26 }
   0xd   :  { %p437_p6 = por %p436_p5, %p435_p4 }
   0xf   :  { %p438_p7 = pnand %p437_p6, %p431_p3 }
  0x11   :  { %441 = shalt.err (!%p438_p7)
}
  0x12   :  { %34 = dma.hbm_to_vmem [thread:$0]  %s849_s1, 128, %s32_s16, [#allocation6]  }
  0x13   :  { %s442_s5 = scalar_lea.hbm %s848_s0, 2048 }
  0x14   :  { %p443_p8 = scmp.ne.s32.totalorder %s848_s0, %s442_s5  ;;  %p446_p9 = scmp.lt.u32.totalorder %s442_s5, %s848_s0 }
  0x16   :  { %p448_p10 = pnand %p446_p9, %p443_p8 }
  0x18   :  { %451 = shalt.err (!%p448_p10)
}
  0x19   :  { %s452_s10 = scalar_lea.vmem %s546_s18, 2048  ;;  %p457_p12 = scmp.lt.s32.totalorder %s546_s18, %s546_s18 }
  0x1a   :  { %p453_p11 = scmp.ne.s32.totalorder %s546_s18, %s452_s10  ;;  %p458_p13 = scmp.lt.s32.totalorder %s452_s10, %s452_s10 }
  0x1c   :  { %p459_p0 = por %p458_p13, %p457_p12 }
  0x1e   :  { %p460_p1 = pnand %p459_p0, %p453_p11 }
  0x20   :  { %463 = shalt.err (!%p460_p1)
}
  0x21   :  { %s516_s1 = smov 128   ;;  %s517_s11 = smov 8  }
  0x22   :  { %24 = dma.hbm_to_vmem [thread:$0]  %s848_s0, 2048, %s546_s18, [#allocation3], %s516_s1, %s516_s1, %s517_s11  }
  0x23   :  { %s518_s14 = smov [#allocation7]   ;;  %s464_s19 = scalar_lea.hbm %s850_s2, 512 }
  0x24   :  { %s40_s15 = sshll.u32 %s518_s14, 4  ;;  %p465_p2 = scmp.ne.s32.totalorder %s850_s2, %s464_s19  ;;  %s41_s15 = int_to_ptr.vmem [resolvable:$true] %s40_s15 }
  0x25   :  { %p468_p3 = scmp.lt.u32.totalorder %s464_s19, %s850_s2 }
  0x27   :  { %p470_p4 = pnand %p468_p3, %p465_p2 }
  0x29   :  { %473 = shalt.err (!%p470_p4)
}
  0x2a   :  { %s474_s24 = scalar_lea.vmem %s41_s15, 512  ;;  %p479_p6 = scmp.lt.s32.totalorder %s41_s15, %s41_s15 }
  0x2b   :  { %p475_p5 = scmp.ne.s32.totalorder %s41_s15, %s474_s24  ;;  %p480_p7 = scmp.lt.s32.totalorder %s474_s24, %s474_s24 }
  0x2d   :  { %p481_p8 = por %p480_p7, %p479_p6 }
  0x2f   :  { %p482_p9 = pnand %p481_p8, %p475_p5 }
  0x31   :  { %485 = shalt.err (!%p482_p9)
}
  0x32   :  { %46 = dma.hbm_to_vmem [thread:$0]  %s850_s2, 512, %s41_s15, [#allocation6], %s516_s1, %s516_s1, %s517_s11  }
  0x33   :  { %508 = dma.done.wait [#allocation3], 2048  }
  0x34   :  { %509 = vsyncadd [#allocation3], 4294965248 }
  0x35   :  { %510 = dma.done.wait [#allocation6], 640  }
  0x36   :  { %511 = vsyncadd [#allocation6], 4294966656  ;;  %v56_v0 = vld [vmem:[#allocation5] sm:$0xff]  ;;  %v66_v8 = vld [vmem:[#allocation2 + $0x8] sm:$0xff]  ;;  %v519_v26 = vmov 0.0   ;;  %s520_s26 = smov [#allocation8]  }
  0x37   :  { %v65_v1 = vld [vmem:[#allocation2] sm:$0xff]  ;;  %v595_v5 = vunpack.c.0.s8 %v56_v0  ;;  %v599_v9 = vld [vmem:[#allocation2 + $0x28] sm:$0xff]  ;;  %v604_v11 = vunpack.c.1.s8 %v56_v0  ;;  %v611_v14 = vunpack.c.2.s8 %v56_v0  ;;  %v625_v25 = vunpack.c.3.s8 %v56_v0  ;;  %v649_v37 = vld [vmem:[#allocation2 + $0x10] sm:$0xff]  ;;  %s337_s27 = sshll.u32 %s520_s26, 4  ;;  %s338_s27 = int_to_ptr.vmem [resolvable:$true] %s337_s27 }
  0x38   :  { %v71_v2 = vld [vmem:[#allocation2 + $0x20] sm:$0xff]  ;;  %v606_v12 = vld [vmem:[#allocation2 + $0x48] sm:$0xff]  ;;  %v76_v13 = vmax.f32 %v66_v8, %v599_v9  ;;  %v651_v38 = vld [vmem:[#allocation2 + $0x30] sm:$0xff]  ;;  %p491_p11 = scmp.lt.s32.totalorder %s338_s27, %s338_s27 }
  0x39   :  { %v81_v3 = vld [vmem:[#allocation2 + $0x40] sm:$0xff]  ;;  %v75_v4 = vmax.f32 %v65_v1, %v71_v2  ;;  %vm115_vm0 = vcmp.eq.s32.totalorder %v595_v5, 0  ;;  %vm157_vm1 = vcmp.eq.s32.totalorder %v595_v5, 1  ;;  %v618_v19 = vld [vmem:[#allocation2 + $0x68] sm:$0xff]  ;;  %vm199_vm2 = vcmp.eq.s32.totalorder %v595_v5, 2  ;;  %v62_v47 = vld [vmem:[#allocation7 + $0x8] sm:$0xff] }
  0x3a   :  { %v597_v6 = vld [vmem:[#allocation2 + $0x60] sm:$0xff]  ;;  %v119_v20 = vsel %vm115_vm0, %v65_v1, 0.0  ;;  %vm241_vm3 = vcmp.eq.s32.totalorder %v595_v5, 3  ;;  %v86_v21 = vmax.f32 %v76_v13, %v606_v12  ;;  %v357_v27 = vsel %vm115_vm0, 1.0, %v519_v26  ;;  %v61_v35 = vld [vmem:[#allocation7] sm:$0xff]  ;;  %v673_v50 = vld [vmem:[#allocation2 + $0x50] sm:$0xff] }
  0x3b   :  { %v85_v7 = vmax.f32 %v75_v4, %v81_v3  ;;  %v361_v28 = vsel %vm157_vm1, 1.0, %v519_v26  ;;  %v161_v31 = vsel %vm157_vm1, %v71_v2, %v119_v20  ;;  %vm116_vm4 = vcmp.eq.s32.totalorder %v604_v11, 0  ;;  %v691_v56 = vld [vmem:[#allocation2 + $0x70] sm:$0xff]  ;;  %v713_v4 = vld [vmem:[#allocation2 + $0x38] sm:$0xff] }
  0x3c   :  { %v634_v30 = vmax.f32 %v86_v21, %v618_v19  ;;  %vm158_vm5 = vcmp.eq.s32.totalorder %v604_v11, 1  ;;  %vm200_vm6 = vcmp.eq.s32.totalorder %v604_v11, 2  ;;  %vm242_vm7 = vcmp.eq.s32.totalorder %v604_v11, 3 }
  0x3d   :  { %v602_v10 = vmax.f32 %v85_v7, %v597_v6  ;;  %v655_v42 = vsel %vm199_vm2, %v81_v3, %v161_v31  ;;  %v365_v43 = vsel %vm199_vm2, 1.0, %v519_v26  ;;  %v369_v44 = vsel %vm241_vm3, 1.0, %v519_v26 }
  0x3e   :  { %v100_v32 = vsub.f32 %v66_v8, %v634_v30  ;;  %v142_v33 = vsub.f32 %v599_v9, %v634_v30  ;;  %v184_v34 = vsub.f32 %v606_v12, %v634_v30  ;;  %v226_v36 = vsub.f32 %v618_v19, %v634_v30 }
  0x3f   :  { %v99_v15 = vsub.f32 %v65_v1, %v602_v10  ;;  %v141_v16 = vsub.f32 %v71_v2, %v602_v10  ;;  %v183_v17 = vsub.f32 %v81_v3, %v602_v10  ;;  %v225_v18 = vsub.f32 %v597_v6, %v602_v10  ;;  %v711_v3 = vld [vmem:[#allocation2 + $0x18] sm:$0xff] }
  0x40   :  { %v105_v39 = vmul.f32 1.442695, %v100_v32  ;;  %v147_v40 = vmul.f32 1.442695, %v142_v33  ;;  %v189_v41 = vmul.f32 1.442695, %v184_v34  ;;  %v77_v53 = vmax.f32 %v649_v37, %v651_v38 }
  0x41   :  { %v103_v22 = vmul.f32 1.442695, %v99_v15  ;;  %v145_v23 = vmul.f32 1.442695, %v141_v16  ;;  %v187_v24 = vmul.f32 1.442695, %v183_v17  ;;  %v78_v31 = vmax.f32 %v711_v3, %v713_v4 }
  0x42   :  { %v229_v29 = vmul.f32 1.442695, %v225_v18  ;;  %v231_v45 = vmul.f32 1.442695, %v226_v36  ;;  %v665_v46 = vsel %vm115_vm0, %v61_v35, -inf  ;;  %v358_v48 = vsel %vm116_vm4, 1.0, %v519_v26 }
  0x43   :  { %380 = vpow2.f32 %v103_v22  ;;  %v362_v49 = vsel %vm158_vm5, 1.0, %v519_v26  ;;  %v366_v51 = vsel %vm200_vm6, 1.0, %v519_v26  ;;  %v370_v52 = vsel %vm242_vm7, 1.0, %v519_v26  ;;  %v63_v18 = vld [vmem:[#allocation7 + $0x10] sm:$0xff] }
  0x44   :  { %382 = vpow2.f32 %v145_v23  ;;  %v685_v54 = vsel %vm157_vm1, %v61_v35, inf  ;;  %v689_v55 = vsel %vm116_vm4, %v66_v8, 0.0  ;;  %vm117_vm8 = vcmp.eq.s32.totalorder %v611_v14, 0  ;;  %v730_v23 = vld [vmem:[#allocation2 + $0x58] sm:$0xff] }
  0x45   :  { %384 = vpow2.f32 %v187_v24  ;;  %v696_v57 = vsel %vm116_vm4, %v62_v47, -inf  ;;  %v87_v58 = vmax.f32 %v77_v53, %v673_v50  ;;  %vm201_vm9 = vcmp.eq.s32.totalorder %v611_v14, 2  ;;  %v739_v36 = vld [vmem:[#allocation2 + $0x78] sm:$0xff] }
  0x46   :  { %386 = vpow2.f32 %v229_v29  ;;  %v131_v59 = vadd.f32 %v358_v48, %v357_v27  ;;  %v173_v60 = vadd.f32 %v362_v49, %v361_v28  ;;  %v215_v61 = vadd.f32 %v366_v51, %v365_v43 }
  0x47   :  { %388 = vpow2.f32 %v105_v39  ;;  %v257_v62 = vadd.f32 %v370_v52, %v369_v44  ;;  %v702_v0 = vsel %vm158_vm5, %v62_v47, inf  ;;  %v705_v1 = vmax.f32 %v87_v58, %v691_v56 }
  0x48   :  { %390 = vpow2.f32 %v147_v40  ;;  %v359_v2 = vsel %vm117_vm8, 1.0, %v519_v26  ;;  %vm159_vm10 = vcmp.eq.s32.totalorder %v611_v14, 1  ;;  %v299_v8 = vmax.f32 %v665_v46, %v696_v57 }
  0x49   :  { %392 = vpow2.f32 %v189_v41  ;;  %v363_v13 = vsel %vm159_vm10, 1.0, %v519_v26  ;;  %v367_v15 = vsel %vm201_vm9, 1.0, %v519_v26  ;;  %vm243_vm11 = vcmp.eq.s32.totalorder %v611_v14, 3 }
  0x4a   :  { %394 = vpow2.f32 %v231_v45  ;;  %v101_v20 = vsub.f32 %v649_v37, %v705_v1  ;;  %v143_v21 = vsub.f32 %v651_v38, %v705_v1  ;;  %v185_v22 = vsub.f32 %v673_v50, %v705_v1 }
  0x4b   :  { %v132_v27 = vadd.f32 %v359_v2, %v131_v59  ;;  %v227_v28 = vsub.f32 %v691_v56, %v705_v1  ;;  %v371_v29 = vsel %vm243_vm11, 1.0, %v519_v26  ;;  %v174_v35 = vadd.f32 %v363_v13, %v173_v60 }
  0x4c   :  { %v107_v33 = vmul.f32 1.442695, %v101_v20  ;;  %v149_v34 = vmul.f32 1.442695, %v143_v21  ;;  %v191_v40 = vmul.f32 1.442695, %v185_v22  ;;  %v216_v41 = vadd.f32 %v367_v15, %v215_v61 }
  0x4d   :  { %v381_v63 = vpop.eup %380  ;;  %v297_v43 = vsel %vm117_vm8, %v63_v18, -inf  ;;  %v88_v44 = vmax.f32 %v78_v31, %v730_v23  ;;  %v233_v48 = vmul.f32 1.442695, %v227_v28  ;;  %v258_v49 = vadd.f32 %v371_v29, %v257_v62 }
  0x4e   :  { %v383_v7 = vpop.eup %382  ;;  %396 = vpow2.f32 %v107_v33  ;;  %vm118_vm12 = vcmp.eq.s32.totalorder %v625_v25, 0  ;;  %vm160_vm13 = vcmp.eq.s32.totalorder %v625_v25, 1  ;;  %vm202_vm14 = vcmp.eq.s32.totalorder %v625_v25, 2 }
  0x4f   :  { %v385_v16 = vpop.eup %384  ;;  %v153_v17 = vadd.f32 %v383_v7, %v381_v63  ;;  %398 = vpow2.f32 %v149_v34  ;;  %v745_v53 = vmax.f32 %v88_v44, %v739_v36  ;;  %v360_v59 = vsel %vm118_vm12, 1.0, %v519_v26 }
  0x50   :  { %v387_v24 = vpop.eup %386  ;;  %v364_v63 = vsel %vm160_vm13, 1.0, %v519_v26  ;;  %vm244_vm15 = vcmp.eq.s32.totalorder %v625_v25, 3  ;;  %v310_v13 = vsel %vm159_vm10, %v63_v18, inf  ;;  %v133_v20 = vadd.f32 %v360_v59, %v132_v27 }
  0x51   :  { %v195_v32 = vadd.f32 %v385_v16, %v153_v17  ;;  %v389_v39 = vpop.eup %388  ;;  %v102_v61 = vsub.f32 %v711_v3, %v745_v53  ;;  %v144_v62 = vsub.f32 %v713_v4, %v745_v53  ;;  %v186_v2 = vsub.f32 %v730_v23, %v745_v53  ;;  %v64_v17 = vld [vmem:[#allocation7 + $0x18] sm:$0xff] }
  0x52   :  { %v391_v45 = vpop.eup %390  ;;  %v368_v22 = vsel %vm202_vm14, 1.0, %v519_v26  ;;  %v175_v28 = vadd.f32 %v364_v63, %v174_v35  ;;  %v372_v31 = vsel %vm244_vm15, 1.0, %v519_v26  ;;  %v312_v18 = vmin.f32 %v685_v54, %v702_v0 }
  0x53   :  { %v237_v47 = vadd.f32 %v387_v24, %v195_v32  ;;  %v393_v51 = vpop.eup %392  ;;  %v154_v52 = vadd.f32 %v391_v45, %v389_v39  ;;  %v109_v15 = vmul.f32 1.442695, %v102_v61  ;;  %v151_v16 = vmul.f32 1.442695, %v144_v62 }
  0x54   :  { %v395_v58 = vpop.eup %394  ;;  %v193_v21 = vmul.f32 1.442695, %v186_v2  ;;  %v228_v24 = vsub.f32 %v739_v36, %v745_v53  ;;  %v217_v29 = vadd.f32 %v368_v22, %v216_v41  ;;  %v259_v32 = vadd.f32 %v372_v31, %v258_v49 }
  0x55   :  { %400 = vlog2.f32 %v237_v47  ;;  %v196_v60 = vadd.f32 %v393_v51, %v154_v52  ;;  %v298_v34 = vsel %vm118_vm12, %v64_v17, -inf  ;;  %v311_v39 = vsel %vm160_vm13, %v64_v17, inf }
  0x56   :  { %402 = vpow2.f32 %v191_v40  ;;  %v235_v27 = vmul.f32 1.442695, %v228_v24  ;;  %v218_v33 = vrot.slane %v217_v29, 4  ;;  %v260_v40 = vrot.slane %v259_v32, 4 }
  0x57   :  { %404 = vpow2.f32 %v233_v48  ;;  %v238_v7 = vadd.f32 %v395_v58, %v196_v60  ;;  %v300_v41 = vmax.f32 %v297_v43, %v298_v34  ;;  %v313_v44 = vmin.f32 %v310_v13, %v311_v39 }
  0x58   :  { %v397_v35 = vpop.eup %396  ;;  %v162_v54 = vsel %vm158_vm5, %v599_v9, %v689_v55  ;;  %v134_v0 = vrot.slane %v133_v20, 4  ;;  %v176_v45 = vrot.slane %v175_v28, 4  ;;  %v219_v52 = vadd.f32 %v218_v33, %v217_v29 }
  0x59   :  { %406 = vlog2.f32 %v238_v7  ;;  %v399_v26 = vpop.eup %398  ;;  %v301_v49 = vmax.f32 %v299_v8, %v300_v41  ;;  %v314_v51 = vmin.f32 %v312_v18, %v313_v44  ;;  %v261_v61 = vadd.f32 %v260_v40, %v259_v32 }
  0x5a   :  { %408 = vpow2.f32 %v109_v15  ;;  %v155_v48 = vadd.f32 %v399_v26, %v397_v35  ;;  %v135_v59 = vadd.f32 %v134_v0, %v133_v20  ;;  %v177_v60 = vadd.f32 %v176_v45, %v175_v28 }
  0x5b   :  { %410 = vpow2.f32 %v151_v16  ;;  %v245_v9 = vsel %vm241_vm3, %v597_v6, %v655_v42  ;;  %v302_v63 = vrot.slane %v301_v49, 4  ;;  %v315_v2 = vrot.slane %v314_v51, 4 }
  0x5c   :  { %412 = vpow2.f32 %v193_v21  ;;  %vm267_vm0 = vcmp.ne.s32.totalorder %v595_v5, 4294967295  ;;  %v136_v57 = vrot.slane %v135_v59, 2  ;;  %v178_v8 = vrot.slane %v177_v60, 2 }
  0x5d   :  { %414 = vpow2.f32 %v235_v27  ;;  %v204_v7 = vsel %vm200_vm6, %v606_v12, %v162_v54  ;;  %v220_v15 = vrot.slane %v219_v52, 2  ;;  %v303_v16 = vmax.f32 %v301_v49, %v302_v63 }
  0x5e   :  { %v316_v21 = vmin.f32 %v314_v51, %v315_v2  ;;  %v262_v6 = vrot.slane %v261_v61, 2  ;;  %v137_v24 = vadd.f32 %v136_v57, %v135_v59  ;;  %v246_v12 = vsel %vm242_vm7, %v618_v19, %v204_v7 }
  0x5f   :  { %v401_v47 = vpop.eup %400  ;;  %v304_v28 = vrot.slane %v303_v16, 2  ;;  %v179_v31 = vadd.f32 %v178_v8, %v177_v60  ;;  %v221_v33 = vadd.f32 %v220_v15, %v219_v52  ;;  %vm268_vm1 = vcmp.ne.s32.totalorder %v604_v11, 4294967295 }
  0x60   :  { %v403_v58 = vpop.eup %402  ;;  %v272_v43 = vmul.f32 0.6931472, %v401_v47  ;;  %v121_v5 = vsel %vm117_vm8, %v649_v37, 0.0  ;;  %v263_v35 = vadd.f32 %v262_v6, %v261_v61  ;;  %v317_v40 = vrot.slane %v316_v21, 2 }
  0x61   :  { %v405_v62 = vpop.eup %404  ;;  %v197_v55 = vadd.f32 %v403_v58, %v155_v48  ;;  %v305_v34 = vmax.f32 %v303_v16, %v304_v28  ;;  %v138_v19 = vrot.slane %v137_v24, 1  ;;  %v180_v54 = vrot.slane %v179_v31, 1 }
  0x62   :  { %v279_v46 = vadd.f32 %v272_v43, %v602_v10  ;;  %v318_v0 = vmin.f32 %v316_v21, %v317_v40  ;;  %v222_v48 = vrot.slane %v221_v33, 1  ;;  %v264_v11 = vrot.slane %v263_v35, 1 }
  0x63   :  { %v239_v13 = vadd.f32 %v405_v62, %v197_v55  ;;  %v407_v17 = vpop.eup %406  ;;  %v306_v26 = vrot.slane %v305_v34, 1  ;;  %v139_v37 = vadd.f32 %v138_v19, %v137_v24  ;;  %vm321_vm2 = vcmask 1040384  }
  0x64   :  { %v283_v20 = vsub.f32 %v279_v46, %v245_v9  ;;  %v409_v42 = vpop.eup %408  ;;  %v274_v22 = vmul.f32 0.6931472, %v407_v17  ;;  %v319_v51 = vrot.slane %v318_v0, 1  ;;  %v181_v58 = vadd.f32 %v180_v54, %v179_v31 }
  0x65   :  { %416 = vlog2.f32 %v239_v13  ;;  %v411_v29 = vpop.eup %410  ;;  %v307_v49 = vmax.f32 %v305_v34, %v306_v26  ;;  %vm323_vm3 = vcmask 1041408   ;;  %v223_v60 = vadd.f32 %v222_v48, %v221_v33 }
  0x66   :  { %v287_v10 = vsel %vm267_vm0, %v283_v20, 0.0  ;;  %v413_v18 = vpop.eup %412  ;;  %v280_v27 = vadd.f32 %v274_v22, %v634_v30  ;;  %v156_v32 = vadd.f32 %v411_v29, %v409_v42  ;;  %v163_v30 = vsel %vm159_vm10, %v651_v38, %v121_v5 }
  0x67   :  { %291 = vst [vmem:[#allocation8] sm:$0xff] %v287_v10  ;;  %v415_v39 = vpop.eup %414  ;;  %v205_v52 = vsel %vm201_vm9, %v673_v50, %v163_v30  ;;  %v320_v43 = vmin.f32 %v318_v0, %v319_v51  ;;  %vm325_vm4 = vcmask 1042432   ;;  %vm327_vm5 = vcmask 1043456  }
  0x68   :  { %v284_v41 = vsub.f32 %v280_v27, %v246_v12  ;;  %v198_v44 = vadd.f32 %v413_v18, %v156_v32  ;;  %v122_v61 = vsel %vm118_vm12, %v711_v3, 0.0  ;;  %v265_v62 = vadd.f32 %v264_v11, %v263_v35 }
  0x69   :  { %v322_v9 = vsel %vm321_vm2, %v307_v49, %v320_v43  ;;  %v247_v55 = vsel %vm243_vm11, %v691_v56, %v205_v52  ;;  %vm329_vm6 = vcmask 1044480   ;;  %vm269_vm7 = vcmp.ne.s32.totalorder %v611_v14, 4294967295 }
  0x6a   :  { %v288_v45 = vsel %vm268_vm1, %v284_v41, 0.0  ;;  %v240_v47 = vadd.f32 %v415_v39, %v198_v44  ;;  %v324_v63 = vsel %vm323_vm3, %v322_v9, %v139_v37  ;;  %v164_v46 = vsel %vm160_vm13, %v713_v4, %v122_v61 }
  0x6b   :  { %292 = vst [vmem:[#allocation8 + $0x8] sm:$0xff] %v288_v45  ;;  %v326_v2 = vsel %vm325_vm4, %v324_v63, %v181_v58  ;;  %v206_v56 = vsel %vm202_vm14, %v730_v23, %v164_v46  ;;  %vm270_vm8 = vcmp.ne.s32.totalorder %v625_v25, 4294967295 }
  0x6c   :  { %418 = vlog2.f32 %v240_v47  ;;  %v328_v57 = vsel %vm327_vm5, %v326_v2, %v223_v60  ;;  %v248_v14 = vsel %vm244_vm15, %v739_v36, %v206_v56 }
  0x6d   :  { %v330_v3 = vsel %vm329_vm6, %v328_v57, %v265_v62 }
  0x6e   :  { %331 = vst [vmem:[%s852_s4] sm:$0x3f] %v330_v3  ;;  %s486_s4 = scalar_lea.vmem %s338_s27, 512 }
  0x6f   :  { %v417_v59 = vpop.eup %416  ;;  %p487_p10 = scmp.ne.s32.totalorder %s338_s27, %s486_s4  ;;  %p492_p12 = scmp.lt.s32.totalorder %s486_s4, %s486_s4 }
  0x70   :  { %v276_v38 = vmul.f32 0.6931472, %v417_v59 }
  0x71   :  { %p493_p13 = por %p492_p12, %p491_p11 }
  0x72   :  { %v281_v50 = vadd.f32 %v276_v38, %v705_v1 }
  0x73   :  { %p494_p0 = pnand %p493_p13, %p487_p10 }
  0x74   :  { %v285_v8 = vsub.f32 %v281_v50, %v247_v55 }
  0x76   :  { %v289_v7 = vsel %vm269_vm7, %v285_v8, 0.0  ;;  %v419_v1 = vpop.eup %418 }
  0x77   :  { %293 = vst [vmem:[#allocation8 + $0x10] sm:$0xff] %v289_v7  ;;  %v278_v13 = vmul.f32 0.6931472, %v419_v1 }
  0x79   :  { %v282_v4 = vadd.f32 %v278_v13, %v745_v53 }
  0x7b   :  { %v286_v15 = vsub.f32 %v282_v4, %v248_v14 }
  0x7d   :  { %v290_v16 = vsel %vm270_vm8, %v286_v15, 0.0 }
  0x7e   :  { %294 = vst [vmem:[#allocation8 + $0x18] sm:$0xff] %v290_v16 }
  0x7f   :  { %497 = shalt.err (!%p494_p0)
}
  0x80   :  { %s498_s30 = scalar_lea.hbm %s851_s3, 512 }
  0x81   :  { %p499_p1 = scmp.ne.s32.totalorder %s851_s3, %s498_s30  ;;  %p502_p2 = scmp.lt.u32.totalorder %s498_s30, %s851_s3 }
  0x83   :  { %p504_p3 = pnand %p502_p2, %p499_p1 }
  0x85   :  { %507 = shalt.err (!%p504_p3)
}
  0x86   :  { %343 = dma.vmem_to_hbm [thread:$0]  %s338_s27, 512, %s851_s3, [#allocation4], %s516_s1, %s516_s1, %s517_s11  }
  0x87   :  { %512 = dma.done.wait [#allocation4], 512  }
  0x88   :  { %513 = vsyncadd [#allocation4], 4294966784 }
  0x89   :  { %351 = vsyncpa [#allocation3], 1 }
  0x8a   :  { %352 = vsyncpa [#allocation6], 1 }
  0x8b   :  { %353 = vsyncpa [#allocation4], 1 }

</bundles_post_ra>
